<compile_context>
chip_gen: v6e
topology: v6e:2x2x1
jax: 0.10.0
libtpu: 0.0.40
codegen_flags: <defaults>
</compile_context>

<pallas_src>
import math

import jax
import jax.numpy as jnp
from jax import lax
from jax.experimental import pallas as pl
from jax.experimental.pallas import tpu as pltpu


# ----------------------------------------------------------------------------
# Shared in-kernel helpers
# ----------------------------------------------------------------------------
def _gelu_exact(x):
    # nn.GELU() default = exact erf formulation
    return 0.5 * x * (1.0 + lax.erf(x * (1.0 / math.sqrt(2.0))))


def _mlp_from_refs(x, w1_ref, b1_ref, w2_ref, b2_ref, ln_w_ref=None, ln_b_ref=None):
    """(optional LayerNorm) -> Linear -> GELU -> Linear. x is an f32 array."""
    x = x.astype(jnp.float32)
    if ln_w_ref is not None:
        mu = jnp.mean(x, axis=-1, keepdims=True)
        var = jnp.mean((x - mu) ** 2, axis=-1, keepdims=True)
        x = (x - mu) * lax.rsqrt(var + 1e-5)
        x = x * ln_w_ref[...] + ln_b_ref[...]
    # bf16 inputs to the MXU, f32 accumulation; element-wise math stays f32.
    h = jnp.dot(x.astype(w1_ref.dtype), w1_ref[...],
                preferred_element_type=jnp.float32) + b1_ref[...]
    h = _gelu_exact(h)
    o = jnp.dot(h.astype(w2_ref.dtype), w2_ref[...],
                preferred_element_type=jnp.float32) + b2_ref[...]
    return o


# ----------------------------------------------------------------------------
# Kernel 1: fully fused  audio MLP + text MLP + AudioTextContrastiveLoss
# ----------------------------------------------------------------------------
def fused_loss_kernel(x_ref, txt_ref, ln_w_ref, ln_b_ref,
                      aw1_ref, ab1_ref, aw2_ref, ab2_ref,
                      tw1_ref, tb1_ref, tw2_ref, tb2_ref,
                      logtemp_ref, loss_ref):
    a = _mlp_from_refs(x_ref[...], aw1_ref, ab1_ref, aw2_ref, ab2_ref,
                       ln_w_ref, ln_b_ref)                       # (B, out) f32
    t = _mlp_from_refs(txt_ref[...], tw1_ref, tb1_ref, tw2_ref, tb2_ref)

    temp = jnp.exp(logtemp_ref[0, 0])
    # Single similarity matmul, contracting last dims (a @ t.T without
    # materializing a transpose). f32 on MXU to match the autocast-disabled
    # similarity in the reference.
    sim = temp * lax.dot_general(a, t, (((1,), (1,)), ((), ())),
                                 preferred_element_type=jnp.float32)  # (B, B)
    bsz = sim.shape[0]

    # Row log-sum-exp (a2t softmax) and column log-sum-exp (t2a softmax, since
    # sim_t2a == sim.T for a scalar temperature).
    m_row = jnp.max(sim, axis=1, keepdims=True)
    lse_row = jnp.log(jnp.sum(jnp.exp(sim - m_row), axis=1, keepdims=True)) + m_row
    m_col = jnp.max(sim, axis=0, keepdims=True)
    lse_col = jnp.log(jnp.sum(jnp.exp(sim - m_col), axis=0, keepdims=True)) + m_col

    rows = lax.broadcasted_iota(jnp.int32, sim.shape, 0)
    cols = lax.broadcasted_iota(jnp.int32, sim.shape, 1)
    diag_sum = jnp.sum(jnp.where(rows == cols, sim, 0.0))

    inv_b = 1.0 / jnp.float32(bsz)
    loss_a2t = (jnp.sum(lse_row) - diag_sum) * inv_b
    loss_t2a = (jnp.sum(lse_col) - diag_sum) * inv_b
    loss = 0.5 * (loss_a2t + loss_t2a)

    # Embed regularization: mean(|e|) / ||e||_2, via rsqrt on the EUP.
    # eps guards the (degenerate) all-zero embedding case.
    loss = loss + jnp.mean(jnp.abs(a)) * lax.rsqrt(jnp.sum(a * a) + 1e-12)
    loss = loss + jnp.mean(jnp.abs(t)) * lax.rsqrt(jnp.sum(t * t) + 1e-12)

    loss_ref[0, 0] = loss


def run_fused_loss(x, text_feats, p):
    vmem = pl.BlockSpec(memory_space=pltpu.MemorySpace.VMEM)
    smem = pl.BlockSpec(memory_space=pltpu.MemorySpace.SMEM)
    out = pl.pallas_call(
        fused_loss_kernel,
        out_shape=jax.ShapeDtypeStruct((1, 1), jnp.float32),
        in_specs=[vmem] * 12 + [smem],
        out_specs=smem,
    )(x, text_feats, p["ln_w"], p["ln_b"],
      p["a_w1"], p["a_b1"], p["a_w2"], p["a_b2"],
      p["t_w1"], p["t_b1"], p["t_w2"], p["t_b2"],
      p["log_temp"])
    return out[0, 0]


# ----------------------------------------------------------------------------
# Kernel 2: fused audio + text MLPs (embedding path), batch grid, weights
#           VMEM-resident across grid steps.
# ----------------------------------------------------------------------------
def fused_embed_kernel(x_ref, txt_ref, ln_w_ref, ln_b_ref,
                       aw1_ref, ab1_ref, aw2_ref, ab2_ref,
                       tw1_ref, tb1_ref, tw2_ref, tb2_ref,
                       a_out_ref, t_out_ref):
    a_out_ref[...] = _mlp_from_refs(
        x_ref[...], aw1_ref, ab1_ref, aw2_ref, ab2_ref,
        ln_w_ref, ln_b_ref).astype(a_out_ref.dtype)
    t_out_ref[...] = _mlp_from_refs(
        txt_ref[...], tw1_ref, tb1_ref, tw2_ref, tb2_ref).astype(t_out_ref.dtype)


def _pick_tb(batch):
    for tb in (512, 256, 128, 64, 32, 16, 8):
        if batch % tb == 0:
            return tb
    return batch


def run_fused_embed(x, text_feats, p):
    B, in_f = x.shape
    text_dim = text_feats.shape[1]
    out_f = p["a_w2"].shape[1]
    TB = _pick_tb(B)
    grid = (B // TB,)

    def row_spec(feat):
        return pl.BlockSpec((TB, feat), lambda i: (i, 0))

    def resident_spec(arr):
        return pl.BlockSpec(arr.shape, lambda i: (0, 0))  # same block every step

    audio_embed, text_embed = pl.pallas_call(
        fused_embed_kernel,
        out_shape=(jax.ShapeDtypeStruct((B, out_f), jnp.float32),
                   jax.ShapeDtypeStruct((B, out_f), jnp.float32)),
        grid=grid,
        in_specs=[row_spec(in_f), row_spec(text_dim),
                  resident_spec(p["ln_w"]), resident_spec(p["ln_b"]),
                  resident_spec(p["a_w1"]), resident_spec(p["a_b1"]),
                  resident_spec(p["a_w2"]), resident_spec(p["a_b2"]),
                  resident_spec(p["t_w1"]), resident_spec(p["t_b1"]),
                  resident_spec(p["t_w2"]), resident_spec(p["t_b2"])],
        out_specs=(pl.BlockSpec((TB, out_f), lambda i: (i, 0)),
                   pl.BlockSpec((TB, out_f), lambda i: (i, 0))),
        compiler_params=pltpu.CompilerParams(
            dimension_semantics=("parallel",)),
    )(x, text_feats, p["ln_w"], p["ln_b"],
      p["a_w1"], p["a_b1"], p["a_w2"], p["a_b2"],
      p["t_w1"], p["t_b1"], p["t_w2"], p["t_b2"])
    return audio_embed, text_embed


# ----------------------------------------------------------------------------
# Parameter init (PyTorch Linear conventions, pre-transposed to (in, out))
# ----------------------------------------------------------------------------
def init_params(key, in_features, hidden_features, out_features, text_dim):
    ks = jax.random.split(key, 4)

    def lin(k, fan_in, fan_out):
        bound = 1.0 / math.sqrt(fan_in)
        kw, kb = jax.random.split(k)
        w = jax.random.uniform(kw, (fan_in, fan_out), jnp.float32, -bound, bound)
        b = jax.random.uniform(kb, (1, fan_out), jnp.float32, -bound, bound)
        # Weights are fed to the MXU in bf16 (f32 accumulation); biases stay f32.
        return w.astype(jnp.bfloat16), b

    p = {}
    p["ln_w"] = jnp.ones((1, in_features), jnp.float32)
    p["ln_b"] = jnp.zeros((1, in_features), jnp.float32)
    p["a_w1"], p["a_b1"] = lin(ks[0], in_features, hidden_features)
    p["a_w2"], p["a_b2"] = lin(ks[1], hidden_features, out_features)
    p["t_w1"], p["t_b1"] = lin(ks[2], text_dim, hidden_features)
    p["t_w2"], p["t_b2"] = lin(ks[3], hidden_features, out_features)
    # AudioTextContrastiveLoss: temperature param = log(1/0.07)
    p["log_temp"] = jnp.full((1, 1), math.log(1.0 / 0.07), jnp.float32)
    return p


def retrival_mlp_forward(x, text_feats, params, return_loss=True):
    if return_loss:
        return run_fused_loss(x, text_feats, params)
    return run_fused_embed(x, text_feats, params)


# ----------------------------------------------------------------------------
# Pure-JAX reference (same bf16-GEMM / f32-accumulate recipe) for validation
# ----------------------------------------------------------------------------
def _ref_forward(x, text_feats, p):
    def mlp(xin, w1, b1, w2, b2, ln_w=None, ln_b=None):
        xin = xin.astype(jnp.float32)
        if ln_w is not None:
            mu = jnp.mean(xin, -1, keepdims=True)
            var = jnp.mean((xin - mu) ** 2, -1, keepdims=True)
            xin = (xin - mu) * lax.rsqrt(var + 1e-5) * ln_w + ln_b
        h = jnp.dot(xin.astype(w1.dtype), w1,
                    preferred_element_type=jnp.float32) + b1
        h = _gelu_exact(h)
        return jnp.dot(h.astype(w2.dtype), w2,
                       preferred_element_type=jnp.float32) + b2

    a = mlp(x, p["a_w1"], p["a_b1"], p["a_w2"], p["a_b2"], p["ln_w"], p["ln_b"])
    t = mlp(text_feats, p["t_w1"], p["t_b1"], p["t_w2"], p["t_b2"])
    temp = jnp.exp(p["log_temp"][0, 0])
    sim = temp * (a @ t.T)
    loss = 0.5 * (-jnp.mean(jnp.diagonal(jax.nn.log_softmax(sim, axis=1)))
                  - jnp.mean(jnp.diagonal(jax.nn.log_softmax(sim, axis=0))))
    loss = loss + jnp.mean(jnp.abs(a)) / jnp.sqrt(jnp.sum(a * a))
    loss = loss + jnp.mean(jnp.abs(t)) / jnp.sqrt(jnp.sum(t * t))
    return a, t, loss


if __name__ == "__main__":
    B = 8
    in_features = 128      # lane-dense feature dims (multiples of 128)
    hidden_features = 256
    out_features = 128
    text_dim = 128

    key = jax.random.PRNGKey(0)
    k_x, k_t, k_p = jax.random.split(key, 3)
    x = jax.random.normal(k_x, (B, in_features), jnp.float32)
    text_feats = jax.random.normal(k_t, (B, text_dim), jnp.float32)
    params = init_params(k_p, in_features, hidden_features, out_features, text_dim)

    audio_embed, text_embed = retrival_mlp_forward(x, text_feats, params,
                                                   return_loss=False)
    loss = retrival_mlp_forward(x, text_feats, params, return_loss=True)
    jax.block_until_ready((audio_embed, text_embed, loss))

    assert audio_embed.shape == (B, out_features)
    assert text_embed.shape == (B, out_features)
    assert jnp.isfinite(loss)

    # Validate against a pure-JAX reference with matching dtype recipe.
    ref_a, ref_t, ref_loss = _ref_forward(x, text_feats, params)
    assert jnp.allclose(audio_embed, ref_a, rtol=5e-2, atol=5e-2)
    assert jnp.allclose(text_embed, ref_t, rtol=5e-2, atol=5e-2)
    assert jnp.allclose(loss, ref_loss, rtol=5e-2, atol=5e-2)

    print("KERNEL_OK")
</pallas_src>

<mosaic_0001>
module attributes {stable_mosaic.version = 11 : i64} {
  func.func @fused_embed_kernel(%arg0: i32, %arg1: memref<8x128xf32, #tpu.memory_space<vmem>>, %arg2: memref<8x128xf32, #tpu.memory_space<vmem>>, %arg3: memref<1x128xf32, #tpu.memory_space<vmem>>, %arg4: memref<1x128xf32, #tpu.memory_space<vmem>>, %arg5: memref<128x256xbf16, #tpu.memory_space<vmem>>, %arg6: memref<1x256xf32, #tpu.memory_space<vmem>>, %arg7: memref<256x128xbf16, #tpu.memory_space<vmem>>, %arg8: memref<1x128xf32, #tpu.memory_space<vmem>>, %arg9: memref<128x256xbf16, #tpu.memory_space<vmem>>, %arg10: memref<1x256xf32, #tpu.memory_space<vmem>>, %arg11: memref<256x128xbf16, #tpu.memory_space<vmem>>, %arg12: memref<1x128xf32, #tpu.memory_space<vmem>>, %arg13: memref<8x128xf32, #tpu.memory_space<vmem>>, %arg14: memref<8x128xf32, #tpu.memory_space<vmem>>) attributes {dimension_semantics = [#tpu.dimension_semantics<parallel>], iteration_bounds = array<i64: 1>, scalar_prefetch = 0 : i64, scratch_operands = 0 : i64, tpu.core_type = #tpu.core_type<tc>, window_params = [{transform_indices = @transform_0, window_bounds = array<i64: 8, 128>}, {transform_indices = @transform_1, window_bounds = array<i64: 8, 128>}, {pipeline_mode = #tpu.pipeline_mode<synchronous>, transform_indices = @transform_2, window_bounds = array<i64: 1, 128>}, {pipeline_mode = #tpu.pipeline_mode<synchronous>, transform_indices = @transform_3, window_bounds = array<i64: 1, 128>}, {pipeline_mode = #tpu.pipeline_mode<synchronous>, transform_indices = @transform_4, window_bounds = array<i64: 128, 256>}, {pipeline_mode = #tpu.pipeline_mode<synchronous>, transform_indices = @transform_5, window_bounds = array<i64: 1, 256>}, {pipeline_mode = #tpu.pipeline_mode<synchronous>, transform_indices = @transform_6, window_bounds = array<i64: 256, 128>}, {pipeline_mode = #tpu.pipeline_mode<synchronous>, transform_indices = @transform_7, window_bounds = array<i64: 1, 128>}, {pipeline_mode = #tpu.pipeline_mode<synchronous>, transform_indices = @transform_8, window_bounds = array<i64: 128, 256>}, {pipeline_mode = #tpu.pipeline_mode<synchronous>, transform_indices = @transform_9, window_bounds = array<i64: 1, 256>}, {pipeline_mode = #tpu.pipeline_mode<synchronous>, transform_indices = @transform_10, window_bounds = array<i64: 256, 128>}, {pipeline_mode = #tpu.pipeline_mode<synchronous>, transform_indices = @transform_11, window_bounds = array<i64: 1, 128>}, {transform_indices = @transform_12, window_bounds = array<i64: 8, 128>}, {transform_indices = @transform_13, window_bounds = array<i64: 8, 128>}]} {
    %c0 = arith.constant 0 : index
    %c0_0 = arith.constant 0 : index
    %0 = vector.load %arg1[%c0, %c0_0] : memref<8x128xf32, #tpu.memory_space<vmem>>, vector<8x128xf32>
    %cst = arith.constant dense<0.000000e+00> : vector<8xf32>
    %1 = vector.multi_reduction <add>, %0, %cst [1] : vector<8x128xf32> to vector<8xf32>
    %2 = vector.shape_cast %1 : vector<8xf32> to vector<8x1xf32>
    %cst_1 = arith.constant 1.280000e+02 : f32
    %3 = vector.broadcast %cst_1 : f32 to vector<8x1xf32>
    %4 = arith.divf %2, %3 : vector<8x1xf32>
    %5 = vector.broadcast %4 : vector<8x1xf32> to vector<8x128xf32>
    %6 = arith.subf %0, %5 : vector<8x128xf32>
    %7 = arith.mulf %6, %6 : vector<8x128xf32>
    %cst_2 = arith.constant dense<0.000000e+00> : vector<8xf32>
    %8 = vector.multi_reduction <add>, %7, %cst_2 [1] : vector<8x128xf32> to vector<8xf32>
    %9 = vector.shape_cast %8 : vector<8xf32> to vector<8x1xf32>
    %cst_3 = arith.constant 1.280000e+02 : f32
    %10 = vector.broadcast %cst_3 : f32 to vector<8x1xf32>
    %11 = arith.divf %9, %10 : vector<8x1xf32>
    %12 = vector.broadcast %4 : vector<8x1xf32> to vector<8x128xf32>
    %13 = arith.subf %0, %12 : vector<8x128xf32>
    %cst_4 = arith.constant 9.99999974E-6 : f32
    %14 = vector.broadcast %cst_4 : f32 to vector<8x1xf32>
    %15 = arith.addf %11, %14 : vector<8x1xf32>
    %16 = math.rsqrt %15 : vector<8x1xf32>
    %17 = vector.broadcast %16 : vector<8x1xf32> to vector<8x128xf32>
    %18 = arith.mulf %13, %17 : vector<8x128xf32>
    %c0_5 = arith.constant 0 : index
    %c0_6 = arith.constant 0 : index
    %19 = vector.load %arg3[%c0_5, %c0_6] : memref<1x128xf32, #tpu.memory_space<vmem>>, vector<1x128xf32>
    %20 = vector.broadcast %19 : vector<1x128xf32> to vector<8x128xf32>
    %21 = arith.mulf %18, %20 : vector<8x128xf32>
    %c0_7 = arith.constant 0 : index
    %c0_8 = arith.constant 0 : index
    %22 = vector.load %arg4[%c0_7, %c0_8] : memref<1x128xf32, #tpu.memory_space<vmem>>, vector<1x128xf32>
    %23 = vector.broadcast %22 : vector<1x128xf32> to vector<8x128xf32>
    %24 = arith.addf %21, %23 : vector<8x128xf32>
    %25 = arith.truncf %24 : vector<8x128xf32> to vector<8x128xbf16>
    %c0_9 = arith.constant 0 : index
    %c0_10 = arith.constant 0 : index
    %26 = vector.load %arg5[%c0_9, %c0_10] : memref<128x256xbf16, #tpu.memory_space<vmem>>, vector<128x256xbf16>
    %cst_11 = arith.constant dense<0.000000e+00> : vector<8x256xf32>
    %27 = tpu.matmul %25, %26, %cst_11 {dimension_numbers = #tpu.dot_dimension_numbers<[1], [0], [0], [1], [0, 0, 1, 1], [], []>} : vector<8x128xbf16>, vector<128x256xbf16>, vector<8x256xf32> -> vector<8x256xf32>
    %c0_12 = arith.constant 0 : index
    %c0_13 = arith.constant 0 : index
    %28 = vector.load %arg6[%c0_12, %c0_13] : memref<1x256xf32, #tpu.memory_space<vmem>>, vector<1x256xf32>
    %29 = vector.broadcast %28 : vector<1x256xf32> to vector<8x256xf32>
    %30 = arith.addf %27, %29 : vector<8x256xf32>
    %cst_14 = arith.constant 5.000000e-01 : f32
    %31 = vector.broadcast %cst_14 : f32 to vector<8x256xf32>
    %32 = arith.mulf %31, %30 : vector<8x256xf32>
    %cst_15 = arith.constant 0.707106769 : f32
    %33 = vector.broadcast %cst_15 : f32 to vector<8x256xf32>
    %34 = arith.mulf %30, %33 : vector<8x256xf32>
    %35 = math.erf %34 : vector<8x256xf32>
    %cst_16 = arith.constant 1.000000e+00 : f32
    %36 = vector.broadcast %cst_16 : f32 to vector<8x256xf32>
    %37 = arith.addf %36, %35 : vector<8x256xf32>
    %38 = arith.mulf %32, %37 : vector<8x256xf32>
    %39 = arith.truncf %38 : vector<8x256xf32> to vector<8x256xbf16>
    %c0_17 = arith.constant 0 : index
    %c0_18 = arith.constant 0 : index
    %40 = vector.load %arg7[%c0_17, %c0_18] : memref<256x128xbf16, #tpu.memory_space<vmem>>, vector<256x128xbf16>
    %cst_19 = arith.constant dense<0.000000e+00> : vector<8x128xf32>
    %41 = tpu.matmul %39, %40, %cst_19 {dimension_numbers = #tpu.dot_dimension_numbers<[1], [0], [0], [1], [0, 0, 1, 1], [], []>} : vector<8x256xbf16>, vector<256x128xbf16>, vector<8x128xf32> -> vector<8x128xf32>
    %c0_20 = arith.constant 0 : index
    %c0_21 = arith.constant 0 : index
    %42 = vector.load %arg8[%c0_20, %c0_21] : memref<1x128xf32, #tpu.memory_space<vmem>>, vector<1x128xf32>
    %43 = vector.broadcast %42 : vector<1x128xf32> to vector<8x128xf32>
    %44 = arith.addf %41, %43 : vector<8x128xf32>
    %c0_22 = arith.constant 0 : index
    %c0_23 = arith.constant 0 : index
    %45 = vector.load %arg13[%c0_22, %c0_23] : memref<8x128xf32, #tpu.memory_space<vmem>>, vector<8x128xf32>
    tpu.vector_store %arg13[%c0_22, %c0_23], %44 {strides = array<i32>} : memref<8x128xf32, #tpu.memory_space<vmem>>, vector<8x128xf32>,
    %c0_24 = arith.constant 0 : index
    %c0_25 = arith.constant 0 : index
    %46 = vector.load %arg2[%c0_24, %c0_25] : memref<8x128xf32, #tpu.memory_space<vmem>>, vector<8x128xf32>
    %47 = arith.truncf %46 : vector<8x128xf32> to vector<8x128xbf16>
    %c0_26 = arith.constant 0 : index
    %c0_27 = arith.constant 0 : index
    %48 = vector.load %arg9[%c0_26, %c0_27] : memref<128x256xbf16, #tpu.memory_space<vmem>>, vector<128x256xbf16>
    %cst_28 = arith.constant dense<0.000000e+00> : vector<8x256xf32>
    %49 = tpu.matmul %47, %48, %cst_28 {dimension_numbers = #tpu.dot_dimension_numbers<[1], [0], [0], [1], [0, 0, 1, 1], [], []>} : vector<8x128xbf16>, vector<128x256xbf16>, vector<8x256xf32> -> vector<8x256xf32>
    %c0_29 = arith.constant 0 : index
    %c0_30 = arith.constant 0 : index
    %50 = vector.load %arg10[%c0_29, %c0_30] : memref<1x256xf32, #tpu.memory_space<vmem>>, vector<1x256xf32>
    %51 = vector.broadcast %50 : vector<1x256xf32> to vector<8x256xf32>
    %52 = arith.addf %49, %51 : vector<8x256xf32>
    %cst_31 = arith.constant 5.000000e-01 : f32
    %53 = vector.broadcast %cst_31 : f32 to vector<8x256xf32>
    %54 = arith.mulf %53, %52 : vector<8x256xf32>
    %cst_32 = arith.constant 0.707106769 : f32
    %55 = vector.broadcast %cst_32 : f32 to vector<8x256xf32>
    %56 = arith.mulf %52, %55 : vector<8x256xf32>
    %57 = math.erf %56 : vector<8x256xf32>
    %cst_33 = arith.constant 1.000000e+00 : f32
    %58 = vector.broadcast %cst_33 : f32 to vector<8x256xf32>
    %59 = arith.addf %58, %57 : vector<8x256xf32>
    %60 = arith.mulf %54, %59 : vector<8x256xf32>
    %61 = arith.truncf %60 : vector<8x256xf32> to vector<8x256xbf16>
    %c0_34 = arith.constant 0 : index
    %c0_35 = arith.constant 0 : index
    %62 = vector.load %arg11[%c0_34, %c0_35] : memref<256x128xbf16, #tpu.memory_space<vmem>>, vector<256x128xbf16>
    %cst_36 = arith.constant dense<0.000000e+00> : vector<8x128xf32>
    %63 = tpu.matmul %61, %62, %cst_36 {dimension_numbers = #tpu.dot_dimension_numbers<[1], [0], [0], [1], [0, 0, 1, 1], [], []>} : vector<8x256xbf16>, vector<256x128xbf16>, vector<8x128xf32> -> vector<8x128xf32>
    %c0_37 = arith.constant 0 : index
    %c0_38 = arith.constant 0 : index
    %64 = vector.load %arg12[%c0_37, %c0_38] : memref<1x128xf32, #tpu.memory_space<vmem>>, vector<1x128xf32>
    %65 = vector.broadcast %64 : vector<1x128xf32> to vector<8x128xf32>
    %66 = arith.addf %63, %65 : vector<8x128xf32>
    %c0_39 = arith.constant 0 : index
    %c0_40 = arith.constant 0 : index
    %67 = vector.load %arg14[%c0_39, %c0_40] : memref<8x128xf32, #tpu.memory_space<vmem>>, vector<8x128xf32>
    tpu.vector_store %arg14[%c0_39, %c0_40], %66 {strides = array<i32>} : memref<8x128xf32, #tpu.memory_space<vmem>>, vector<8x128xf32>,
    return
  }
  func.func @transform_0(%arg0: i32) -> (i32, i32) {
    %c0_i32 = arith.constant 0 : i32
    %c0_i32_0 = arith.constant 0 : i32
    return %arg0, %c0_i32 : i32, i32
  }
  func.func @transform_1(%arg0: i32) -> (i32, i32) {
    %c0_i32 = arith.constant 0 : i32
    %c0_i32_0 = arith.constant 0 : i32
    return %arg0, %c0_i32 : i32, i32
  }
  func.func @transform_2(%arg0: i32) -> (i32, i32) {
    %c0_i32 = arith.constant 0 : i32
    %c0_i32_0 = arith.constant 0 : i32
    %c0_i32_1 = arith.constant 0 : i32
    return %c0_i32, %c0_i32_0 : i32, i32
  }
  func.func @transform_3(%arg0: i32) -> (i32, i32) {
    %c0_i32 = arith.constant 0 : i32
    %c0_i32_0 = arith.constant 0 : i32
    %c0_i32_1 = arith.constant 0 : i32
    return %c0_i32, %c0_i32_0 : i32, i32
  }
  func.func @transform_4(%arg0: i32) -> (i32, i32) {
    %c0_i32 = arith.constant 0 : i32
    %c0_i32_0 = arith.constant 0 : i32
    %c0_i32_1 = arith.constant 0 : i32
    return %c0_i32, %c0_i32_0 : i32, i32
  }
  func.func @transform_5(%arg0: i32) -> (i32, i32) {
    %c0_i32 = arith.constant 0 : i32
    %c0_i32_0 = arith.constant 0 : i32
    %c0_i32_1 = arith.constant 0 : i32
    return %c0_i32, %c0_i32_0 : i32, i32
  }
  func.func @transform_6(%arg0: i32) -> (i32, i32) {
    %c0_i32 = arith.constant 0 : i32
    %c0_i32_0 = arith.constant 0 : i32
    %c0_i32_1 = arith.constant 0 : i32
    return %c0_i32, %c0_i32_0 : i32, i32
  }
  func.func @transform_7(%arg0: i32) -> (i32, i32) {
    %c0_i32 = arith.constant 0 : i32
    %c0_i32_0 = arith.constant 0 : i32
    %c0_i32_1 = arith.constant 0 : i32
    return %c0_i32, %c0_i32_0 : i32, i32
  }
  func.func @transform_8(%arg0: i32) -> (i32, i32) {
    %c0_i32 = arith.constant 0 : i32
    %c0_i32_0 = arith.constant 0 : i32
    %c0_i32_1 = arith.constant 0 : i32
    return %c0_i32, %c0_i32_0 : i32, i32
  }
  func.func @transform_9(%arg0: i32) -> (i32, i32) {
    %c0_i32 = arith.constant 0 : i32
    %c0_i32_0 = arith.constant 0 : i32
    %c0_i32_1 = arith.constant 0 : i32
    return %c0_i32, %c0_i32_0 : i32, i32
  }
  func.func @transform_10(%arg0: i32) -> (i32, i32) {
    %c0_i32 = arith.constant 0 : i32
    %c0_i32_0 = arith.constant 0 : i32
    %c0_i32_1 = arith.constant 0 : i32
    return %c0_i32, %c0_i32_0 : i32, i32
  }
  func.func @transform_11(%arg0: i32) -> (i32, i32) {
    %c0_i32 = arith.constant 0 : i32
    %c0_i32_0 = arith.constant 0 : i32
    %c0_i32_1 = arith.constant 0 : i32
    return %c0_i32, %c0_i32_0 : i32, i32
  }
  func.func @transform_12(%arg0: i32) -> (i32, i32) {
    %c0_i32 = arith.constant 0 : i32
    %c0_i32_0 = arith.constant 0 : i32
    return %arg0, %c0_i32 : i32, i32
  }
  func.func @transform_13(%arg0: i32) -> (i32, i32) {
    %c0_i32 = arith.constant 0 : i32
    %c0_i32_0 = arith.constant 0 : i32
    return %arg0, %c0_i32 : i32, i32
  }
}

</mosaic_0001>

<bundles_post_ra>
// kernel: tpu_custom_call.1
= control target key start
LH: loop header
LB: loop body
LE: loop exit
PB: predicated region body
PF: predicated region fallthrough
CT: control target
= control target key end

     0   :  { %19 = vsyncpa [#allocation3], 0  ;;  %s1407_s0 = inlined_call_operand.hbm [shape: f32[8,128], index: 0, kind: input, shape index: {}]   ;;  %s1408_s1 = inlined_call_operand.hbm [shape: f32[8,128], index: 1, kind: input, shape index: {}]   ;;  %s1409_s2 = inlined_call_operand.vmem [shape: f32[1,128], index: 2, kind: input, shape index: {}]   ;;  %s1410_s3 = inlined_call_operand.hbm [shape: f32[1,128], index: 3, kind: input, shape index: {}]   ;;  %s1411_s4 = inlined_call_operand.hbm [shape: bf16[128,256], index: 4, kind: input, shape index: {}]   ;;  %s1412_s5 = inlined_call_operand.vmem [shape: f32[1,256], index: 5, kind: input, shape index: {}]   ;;  %s1413_s6 = inlined_call_operand.hbm [shape: bf16[256,128], index: 6, kind: input, shape index: {}]   ;;  %s1414_s7 = inlined_call_operand.vmem [shape: f32[1,128], index: 7, kind: input, shape index: {}]   ;;  %s1415_s8 = inlined_call_operand.hbm [shape: bf16[128,256], index: 8, kind: input, shape index: {}]   ;;  %s1416_s9 = inlined_call_operand.vmem [shape: f32[1,256], index: 9, kind: input, shape index: {}]   ;;  %s1417_s10 = inlined_call_operand.hbm [shape: bf16[256,128], index: 10, kind: input, shape index: {}]   ;;  %s1418_s11 = inlined_call_operand.vmem [shape: f32[1,128], index: 11, kind: input, shape index: {}]   ;;  %s1419_s12 = inlined_call_operand.hbm [shape: f32[8,128], index: 12, kind: output, shape index: {0}]   ;;  %s1420_s13 = inlined_call_operand.hbm [shape: f32[8,128], index: 13, kind: output, shape index: {1}]  }
   0x1   :  { %20 = vsyncpa [#allocation6], 0 }
   0x2   :  { %21 = vsyncpa [#allocation9], 0 }
   0x3   :  { %22 = vsyncpa [#allocation12], 0 }
   0x4   :  { %23 = vsyncpa [#allocation4], 0 }
   0x5   :  { %24 = vsyncpa [#allocation16], 0  ;;  %s1281_s25 = smov [#allocation5]   ;;  %s1282_s27 = smov [#allocation8]  }
   0x6   :  { %s41_s26 = sshll.u32 %s1281_s25, 4  ;;  %s62_s28 = sshll.u32 %s1282_s27, 4  ;;  %s42_s26 = int_to_ptr.vmem [resolvable:$true] %s41_s26  ;;  %s63_s28 = int_to_ptr.vmem [resolvable:$true] %s62_s28 }
   0x7   :  { %s1097_s29 = scalar_lea.vmem %s42_s26, 128  ;;  %p1102_p1 = scmp.lt.s32.totalorder %s42_s26, %s42_s26 }
   0x8   :  { %p1098_p0 = scmp.ne.s32.totalorder %s42_s26, %s1097_s29  ;;  %p1103_p2 = scmp.lt.s32.totalorder %s1097_s29, %s1097_s29 }
   0xa   :  { %p1104_p3 = por %p1103_p2, %p1102_p1 }
   0xc   :  { %p1105_p4 = pnand %p1104_p3, %p1098_p0 }
   0xe   :  { %1108 = shalt.err (!%p1105_p4)
}
   0xf   :  { %44 = dma.hbm_to_vmem [thread:$0]  %s1408_s1, 128, %s42_s26, [#allocation6]  }
  0x10   :  { %s1117_s15 = scalar_lea.vmem %s63_s28, 2048  ;;  %p1122_p6 = scmp.lt.s32.totalorder %s63_s28, %s63_s28 }
  0x11   :  { %p1118_p5 = scmp.ne.s32.totalorder %s63_s28, %s1117_s15  ;;  %p1123_p7 = scmp.lt.s32.totalorder %s1117_s15, %s1117_s15 }
  0x13   :  { %p1124_p8 = por %p1123_p7, %p1122_p6 }
  0x15   :  { %p1125_p9 = pnand %p1124_p8, %p1118_p5 }
  0x17   :  { %1128 = shalt.err (!%p1125_p9)
}
  0x18   :  { %s1283_s16 = smov 128   ;;  %s1284_s17 = smov 8  }
  0x19   :  { %68 = dma.hbm_to_vmem [thread:$0]  %s1411_s4, 2048, %s63_s28, [#allocation9], %s1283_s16, %s1283_s16, %s1284_s17  }
  0x1a   :  { %s1285_s20 = smov [#allocation11]   ;;  %s1286_s22 = smov [#allocation2]  }
  0x1b   :  { %s90_s21 = sshll.u32 %s1285_s20, 4  ;;  %s31_s23 = sshll.u32 %s1286_s22, 4  ;;  %s91_s21 = int_to_ptr.vmem [resolvable:$true] %s90_s21  ;;  %s32_s23 = int_to_ptr.vmem [resolvable:$true] %s31_s23 }
  0x1c   :  { %s1137_s1 = scalar_lea.vmem %s91_s21, 2048  ;;  %p1142_p11 = scmp.lt.s32.totalorder %s91_s21, %s91_s21 }
  0x1d   :  { %p1138_p10 = scmp.ne.s32.totalorder %s91_s21, %s1137_s1  ;;  %p1143_p12 = scmp.lt.s32.totalorder %s1137_s1, %s1137_s1 }
  0x1f   :  { %p1144_p13 = por %p1143_p12, %p1142_p11 }
  0x21   :  { %p1145_p0 = pnand %p1144_p13, %p1138_p10 }
  0x23   :  { %1148 = shalt.err (!%p1145_p0)
}
  0x24   :  { %96 = dma.hbm_to_vmem [thread:$0]  %s1415_s8, 2048, %s91_s21, [#allocation12], %s1283_s16, %s1283_s16, %s1284_s17  }
  0x25   :  { %s1157_s26 = scalar_lea.vmem %s32_s23, 128  ;;  %p1162_p2 = scmp.lt.s32.totalorder %s32_s23, %s32_s23 }
  0x26   :  { %p1158_p1 = scmp.ne.s32.totalorder %s32_s23, %s1157_s26  ;;  %p1163_p3 = scmp.lt.s32.totalorder %s1157_s26, %s1157_s26 }
  0x28   :  { %p1164_p4 = por %p1163_p3, %p1162_p2 }
  0x2a   :  { %p1165_p5 = pnand %p1164_p4, %p1158_p1 }
  0x2c   :  { %1168 = shalt.err (!%p1165_p5)
}
  0x2d   :  { %34 = dma.hbm_to_vmem [thread:$0]  %s1407_s0, 128, %s32_s23, [#allocation3]  }
  0x2e   :  { %s1287_s28 = smov [#allocation7]   ;;  %s1288_s30 = smov [#allocation10]  }
  0x2f   :  { %s53_s29 = sshll.u32 %s1287_s28, 4  ;;  %s76_s14 = sshll.u32 %s1288_s30, 4  ;;  %s54_s29 = int_to_ptr.vmem [resolvable:$true] %s53_s29  ;;  %s77_s14 = int_to_ptr.vmem [resolvable:$true] %s76_s14 }
  0x30   :  { %s1177_s15 = scalar_lea.vmem %s54_s29, 16  ;;  %s1181_s8 = scalar_lea.vmem %s54_s29, 32 }
  0x31   :  { %p1178_p6 = scmp.ne.s32.totalorder %s54_s29, %s1177_s15  ;;  %p1182_p7 = scmp.lt.s32.totalorder %s54_s29, %s54_s29 }
  0x32   :  { %p1183_p8 = scmp.lt.s32.totalorder %s1181_s8, %s1177_s15 }
  0x34   :  { %p1184_p9 = por %p1183_p8, %p1182_p7 }
  0x36   :  { %p1185_p10 = pnand %p1184_p9, %p1178_p6 }
  0x38   :  { %1188 = shalt.err (!%p1185_p10)
}
  0x39   :  { %56 = dma.hbm_to_vmem [thread:$0]  %s1410_s3, 16, %s54_s29, [#allocation6]  }
  0x3a   :  { %s1197_s18 = scalar_lea.vmem %s77_s14, 2048  ;;  %p1202_p12 = scmp.lt.s32.totalorder %s77_s14, %s77_s14 }
  0x3b   :  { %p1198_p11 = scmp.ne.s32.totalorder %s77_s14, %s1197_s18  ;;  %p1203_p13 = scmp.lt.s32.totalorder %s1197_s18, %s1197_s18 }
  0x3d   :  { %p1204_p0 = por %p1203_p13, %p1202_p12 }
  0x3f   :  { %p1205_p1 = pnand %p1204_p0, %p1198_p11 }
  0x41   :  { %1208 = shalt.err (!%p1205_p1)
}
  0x42   :  { %s1289_s0 = smov 64   ;;  %s1290_s19 = smov 4  }
  0x43   :  { %82 = dma.hbm_to_vmem [thread:$0]  %s1413_s6, 2048, %s77_s14, [#allocation9], %s1289_s0, %s1289_s0, %s1290_s19  }
  0x44   :  { %s1291_s22 = smov [#allocation13]  }
  0x45   :  { %s104_s23 = sshll.u32 %s1291_s22, 4  ;;  %s105_s23 = int_to_ptr.vmem [resolvable:$true] %s104_s23 }
  0x46   :  { %s1217_s1 = scalar_lea.vmem %s105_s23, 2048  ;;  %p1222_p3 = scmp.lt.s32.totalorder %s105_s23, %s105_s23 }
  0x47   :  { %p1218_p2 = scmp.ne.s32.totalorder %s105_s23, %s1217_s1  ;;  %p1223_p4 = scmp.lt.s32.totalorder %s1217_s1, %s1217_s1 }
  0x49   :  { %p1224_p5 = por %p1223_p4, %p1222_p3 }
  0x4b   :  { %p1225_p6 = pnand %p1224_p5, %p1218_p2 }
  0x4d   :  { %1228 = shalt.err (!%p1225_p6)
}
  0x4e   :  { %110 = dma.hbm_to_vmem [thread:$0]  %s1417_s10, 2048, %s105_s23, [#allocation12], %s1289_s0, %s1289_s0, %s1290_s19  }
  0x4f   :  { %1269 = dma.done.wait [#allocation3], 128  }
  0x50   :  { %1270 = vsyncadd [#allocation3], 4294967168 }
  0x51   :  { %1271 = dma.done.wait [#allocation6], 144  }
  0x52   :  { %1272 = vsyncadd [#allocation6], 4294967152 }
  0x53   :  { %1273 = dma.done.wait [#allocation9], 4096  }
  0x54   :  { %1274 = vsyncadd [#allocation9], 4294963200 }
  0x55   :  { %1275 = dma.done.wait [#allocation12], 4096  }
  0x56   :  { %1276 = vsyncadd [#allocation12], 4294963200  ;;  %v135_v0 = vld [vmem:[#allocation2] sm:$0xff]  ;;  %v1004_v4 = vld [vmem:[#allocation8 + $0x60] ss:$8 sps:$4 sm:$0xff]   ;;  %v1292_v16 = vmov 0  }
  0x57   :  { %136 = vadd.xlane.f32.xlu0 %v135_v0  ;;  %v999_v1 = vld [vmem:[#allocation8 + $0x74] ss:$8 sps:$4 sm:$0xff]   ;;  %v1001_v2 = vld [vmem:[#allocation8 + $0x70] ss:$8 sps:$4 sm:$0xff]   ;;  %v1002_v3 = vld [vmem:[#allocation8 + $0x64] ss:$8 sps:$4 sm:$0xff]   ;;  %305 = vmatprep.mubr.bf16.mxu0 %v1292_v16 }
  0x58   :  { %273 = vmatprep.subr.bf16.mxu0 %v999_v1  ;;  %v1005_v9 = vld [vmem:[#allocation8 + $0x54] ss:$8 sps:$4 sm:$0xff]   ;;  %v1007_v10 = vld [vmem:[#allocation8 + $0x50] ss:$8 sps:$4 sm:$0xff]   ;;  %v1008_v11 = vld [vmem:[#allocation8 + $0x44] ss:$8 sps:$4 sm:$0xff]  }
  0x59   :  { %274 = vmatpush1.bf16.msra.mxu0 %v1001_v2  ;;  %v1010_v12 = vld [vmem:[#allocation8 + $0x40] ss:$8 sps:$4 sm:$0xff]   ;;  %v1011_v13 = vld [vmem:[#allocation8 + $0x34] ss:$8 sps:$4 sm:$0xff]   ;;  %v1013_v14 = vld [vmem:[#allocation8 + $0x30] ss:$8 sps:$4 sm:$0xff]  }
  0x5a   :  { %275 = vmatprep.subr.bf16.mxu0 %v1002_v3  ;;  %v1014_v15 = vld [vmem:[#allocation8 + $0x24] ss:$8 sps:$4 sm:$0xff]   ;;  %v1016_v17 = vld [vmem:[#allocation8 + $0x20] ss:$8 sps:$4 sm:$0xff]   ;;  %v1017_v18 = vld [vmem:[#allocation8 + $0x14] ss:$8 sps:$4 sm:$0xff]   ;;  %v183_v3 = vlaneseq }
  0x5b   :  { %v1019_v19 = vld [vmem:[#allocation8 + $0x10] ss:$8 sps:$4 sm:$0xff]   ;;  %v1020_v20 = vld [vmem:[#allocation8 + $0x4] ss:$8 sps:$4 sm:$0xff]   ;;  %v1022_v21 = vld [vmem:[#allocation8] ss:$8 sps:$4 sm:$0xff]  }
  0x5c   :  { %v1025_v22 = vld [vmem:[#allocation11 + $0x74] ss:$8 sps:$4 sm:$0xff]   ;;  %v873_v30 = vld [vmem:[%s1409_s2] ss:$0 sm:$0xff]  ;;  %v1023_v35 = vld [vmem:[#allocation11 + $0x70] ss:$8 sps:$4 sm:$0xff]  }
  0x5d   :  { %276 = vmatpush1.bf16.msra.mxu0 %v1004_v4  ;;  %v1047_v23 = vld [vmem:[#allocation10 + $0x78] sm:$0xff]   ;;  %v1049_v25 = vld [vmem:[#allocation10 + $0x70] sm:$0xff]   ;;  %v1028_v37 = vld [vmem:[#allocation11 + $0x64] ss:$8 sps:$4 sm:$0xff]   ;;  %v184_v4 = vshrl.u32 %v183_v3, 7  ;;  %s1293_s27 = smov [#allocation14]  }
  0x5e   :  { %277 = vmatprep.subr.bf16.mxu0 %v1005_v9  ;;  %v1048_v24 = vld [vmem:[#allocation10 + $0x38] sm:$0xff]   ;;  %941 = vmatprep.subr.bf16.mxu1 %v1047_v23  ;;  %v1026_v38 = vld [vmem:[#allocation11 + $0x60] ss:$8 sps:$4 sm:$0xff]   ;;  %v1034_v41 = vld [vmem:[#allocation11 + $0x44] ss:$8 sps:$4 sm:$0xff]   ;;  %s847_s28 = sshll.u32 %s1293_s27, 4  ;;  %s848_s28 = int_to_ptr.vmem [resolvable:$true] %s847_s28 }
  0x5f   :  { %942 = vmatpush3.bf16.msra.mxu1 %v1048_v24  ;;  %v874_v32 = vld [vmem:[#allocation7] ss:$0 sm:$0xff]  ;;  %v1029_v40 = vld [vmem:[#allocation11 + $0x50] ss:$8 sps:$4 sm:$0xff]   ;;  %v1032_v42 = vld [vmem:[#allocation11 + $0x40] ss:$8 sps:$4 sm:$0xff]   ;;  %p1234_p8 = scmp.lt.s32.totalorder %s848_s28, %s848_s28 }
  0x60   :  { %943 = vmatprep.subr.bf16.mxu1 %v1049_v25  ;;  %v1031_v39 = vld [vmem:[#allocation11 + $0x54] ss:$8 sps:$4 sm:$0xff]   ;;  %v1035_v44 = vld [vmem:[#allocation11 + $0x30] ss:$8 sps:$4 sm:$0xff]   ;;  %v1040_v45 = vld [vmem:[#allocation11 + $0x24] ss:$8 sps:$4 sm:$0xff]  }
  0x61   :  { %278 = vmatpush1.bf16.msra.mxu0 %v1007_v10  ;;  %v1037_v43 = vld [vmem:[#allocation11 + $0x34] ss:$8 sps:$4 sm:$0xff]   ;;  %v1038_v46 = vld [vmem:[#allocation11 + $0x20] ss:$8 sps:$4 sm:$0xff]   ;;  %v1041_v48 = vld [vmem:[#allocation11 + $0x10] ss:$8 sps:$4 sm:$0xff]  }
  0x62   :  { %279 = vmatprep.subr.bf16.mxu0 %v1008_v11  ;;  %v1043_v47 = vld [vmem:[#allocation11 + $0x14] ss:$8 sps:$4 sm:$0xff]   ;;  %v1046_v49 = vld [vmem:[#allocation11 + $0x4] ss:$8 sps:$4 sm:$0xff]   ;;  %v1044_v50 = vld [vmem:[#allocation11] ss:$8 sps:$4 sm:$0xff]  }
  0x63   :  { %v502_v51 = vld [vmem:[#allocation5] sm:$0xff]  ;;  %v1051_v54 = vld [vmem:[#allocation10 + $0x68] sm:$0xff]   ;;  %v1053_v56 = vld [vmem:[#allocation10 + $0x60] sm:$0xff]   ;;  %s1229_s29 = scalar_lea.vmem %s848_s28, 128 }
  0x64   :  { %v503_v52 = vpack.c.bf16 %v502_v51, %v502_v51  ;;  %v1050_v53 = vld [vmem:[#allocation10 + $0x30] sm:$0xff]   ;;  %v1052_v55 = vld [vmem:[#allocation10 + $0x28] sm:$0xff]   ;;  %v1054_v57 = vld [vmem:[#allocation10 + $0x20] sm:$0xff]   ;;  %p1230_p7 = scmp.ne.s32.totalorder %s848_s28, %s1229_s29  ;;  %p1235_p9 = scmp.lt.s32.totalorder %s1229_s29, %s1229_s29 }
  0x65   :  { %280 = vmatpush1.bf16.msra.mxu0 %v1010_v12  ;;  %944 = vmatpush3.bf16.msra.mxu1 %v1050_v53  ;;  %v1055_v58 = vld [vmem:[#allocation10 + $0x58] sm:$0xff]   ;;  %v1057_v60 = vld [vmem:[#allocation10 + $0x50] sm:$0xff]   ;;  %v1059_v62 = vld [vmem:[#allocation10 + $0x48] sm:$0xff]  }
  0x66   :  { %281 = vmatprep.subr.bf16.mxu0 %v1011_v13  ;;  %945 = vmatprep.subr.bf16.mxu1 %v1051_v54  ;;  %v1056_v59 = vld [vmem:[#allocation10 + $0x18] sm:$0xff]   ;;  %v1058_v61 = vld [vmem:[#allocation10 + $0x10] sm:$0xff]   ;;  %v1060_v63 = vld [vmem:[#allocation10 + $0x8] sm:$0xff]   ;;  %p1236_p10 = por %p1235_p9, %p1234_p8 }
  0x67   :  { %v1062_v1 = vld [vmem:[#allocation10] sm:$0xff]   ;;  %v1063_v2 = vld [vmem:[#allocation13 + $0x78] sm:$0xff]   ;;  %v1076_v51 = vld [vmem:[#allocation13 + $0x8] sm:$0xff]  }
  0x68   :  { %v1077_v53 = vld [vmem:[#allocation13 + $0x40] sm:$0xff]   ;;  %p1237_p11 = pnand %p1236_p10, %p1230_p7 }
  0x69   :  { %282 = vmatpush1.bf16.msra.mxu0 %v1013_v14  ;;  %946 = vmatpush3.bf16.msra.mxu1 %v1052_v55 }
  0x6a   :  { %283 = vmatprep.subr.bf16.mxu0 %v1014_v15  ;;  %947 = vmatprep.subr.bf16.mxu1 %v1053_v56 }
  0x6d   :  { %284 = vmatpush1.bf16.msra.mxu0 %v1016_v17  ;;  %948 = vmatpush3.bf16.msra.mxu1 %v1054_v57 }
  0x6e   :  { %285 = vmatprep.subr.bf16.mxu0 %v1017_v18  ;;  %949 = vmatprep.subr.bf16.mxu1 %v1055_v58  ;;  %v1078_v58 = vld [vmem:[#allocation13] sm:$0xff]  }
  0x71   :  { %286 = vmatpush1.bf16.msra.mxu0 %v1019_v19  ;;  %950 = vmatpush3.bf16.msra.mxu1 %v1056_v59 }
  0x72   :  { %287 = vmatprep.subr.bf16.mxu0 %v1020_v20  ;;  %951 = vmatprep.subr.bf16.mxu1 %v1057_v60 }
  0x75   :  { %288 = vmatpush1.bf16.msra.mxu0 %v1022_v21  ;;  %952 = vmatpush3.bf16.msra.mxu1 %v1058_v61 }
  0x76   :  { %612 = vmatprep.subr.bf16.mxu0 %v1025_v22  ;;  %953 = vmatprep.subr.bf16.mxu1 %v1059_v62 }
  0x79   :  { %954 = vmatpush3.bf16.msra.mxu1 %v1060_v63 }
  0xe0   :  { %v137_v5 = vpop.xlane.xlu0 %136 }
  0xe1   :  { %v139_v6 = vmul.f32 0.0078125, %v137_v5  ;;  %v185_v5 = vsub.s32 0, %v184_v4 }
  0xe3   :  { %v140_v7 = vsub.f32 %v135_v0, %v139_v6  ;;  %v1061_v0 = vld [vmem:[#allocation10 + $0x40] sm:$0xff]   ;;  %v181_v6 = vld [vmem:[%s1412_s5] sm:$0x3] }
  0xe4   :  { %955 = vmatprep.subr.bf16.mxu1 %v1061_v0 }
  0xe5   :  { %v141_v8 = vmul.f32 %v140_v7, %v140_v7  ;;  %956 = vmatpush3.bf16.msra.mxu1 %v1062_v1  ;;  %v891_v1 = vld [vmem:[%s1414_s7] ss:$0 sm:$0xff] }
  0xe6   :  { %963 = vmatprep.subr.bf16.mxu1 %v1063_v2 }
  0xe7   :  { %142 = vadd.xlane.f32.xlu0 %v141_v8  ;;  %v186_v8 = vrot.slane %v181_v6, %v185_v5 }
 0x170   :  { %v143_v26 = vpop.xlane.xlu0 %142 }
 0x171   :  { %v144_v27 = vmul.f32 0.0078125, %v143_v26 }
 0x173   :  { %v145_v28 = vadd.f32 1e-05, %v144_v27  ;;  %v1064_v27 = vld [vmem:[#allocation13 + $0x38] sm:$0xff]  }
 0x175   :  { %1079 = vrsqrt.f32 %v145_v28 }
 0x182   :  { %v1080_v29 = vpop.eup %1079 }
 0x183   :  { %v147_v31 = vmul.f32 %v1080_v29, %v140_v7  ;;  %v189_v7 = vsub.s32 1, %v184_v4  ;;  %v520_v29 = vld [vmem:[%s1416_s9] sm:$0x3] }
 0x185   :  { %v155_v33 = vmul.f32 %v873_v30, %v147_v31  ;;  %v190_v9 = vrot.slane %v181_v6, %v189_v7  ;;  %v1065_v30 = vld [vmem:[#allocation13 + $0x70] sm:$0xff]   ;;  %v525_v31 = vrot.slane %v520_v29, %v185_v5 }
 0x187   :  { %v163_v34 = vadd.f32 %v874_v32, %v155_v33  ;;  %v1066_v32 = vld [vmem:[#allocation13 + $0x30] sm:$0xff]   ;;  %v1067_v33 = vld [vmem:[#allocation13 + $0x68] sm:$0xff]  }
 0x189   :  { %v164_v36 = vpack.c.bf16 %v163_v34, %v163_v34  ;;  %v529_v34 = vrot.slane %v520_v29, %v189_v7 }
 0x18b   :  { %306 = vmatmul.mubr.bf16.vlgmr.msra.gmra.mxu0 %v164_v36 }
 0x18c   :  { %613 = vmatpush1.bf16.msra.mxu0 %v1023_v35  ;;  %644 = vmatprep.mubr.bf16.mxu0 %v1292_v16 }
 0x18d   :  { %614 = vmatprep.subr.bf16.mxu0 %v1028_v37  ;;  %v1068_v37 = vld [vmem:[#allocation13 + $0x28] sm:$0xff]  }
 0x190   :  { %615 = vmatpush1.bf16.msra.mxu0 %v1026_v38 }
 0x191   :  { %616 = vmatprep.subr.bf16.mxu0 %v1031_v39  ;;  %v1069_v39 = vld [vmem:[#allocation13 + $0x60] sm:$0xff]  }
 0x194   :  { %617 = vmatpush1.bf16.msra.mxu0 %v1029_v40 }
 0x195   :  { %618 = vmatprep.subr.bf16.mxu0 %v1034_v41 }
 0x198   :  { %619 = vmatpush1.bf16.msra.mxu0 %v1032_v42 }
 0x199   :  { %620 = vmatprep.subr.bf16.mxu0 %v1037_v43 }
 0x19c   :  { %621 = vmatpush1.bf16.msra.mxu0 %v1035_v44  ;;  %v1070_v44 = vld [vmem:[#allocation13 + $0x20] sm:$0xff]  }
 0x19d   :  { %622 = vmatprep.subr.bf16.mxu0 %v1040_v45 }
 0x1a0   :  { %623 = vmatpush1.bf16.msra.mxu0 %v1038_v46  ;;  %v1071_v46 = vld [vmem:[#allocation13 + $0x58] sm:$0xff]  }
 0x1a1   :  { %624 = vmatprep.subr.bf16.mxu0 %v1043_v47  ;;  %v1072_v47 = vld [vmem:[#allocation13 + $0x18] sm:$0xff]  }
 0x1a4   :  { %625 = vmatpush1.bf16.msra.mxu0 %v1041_v48  ;;  %v1073_v48 = vld [vmem:[#allocation13 + $0x50] sm:$0xff]  }
 0x1a5   :  { %626 = vmatprep.subr.bf16.mxu0 %v1046_v49  ;;  %v1074_v49 = vld [vmem:[#allocation13 + $0x10] sm:$0xff]  }
 0x1a8   :  { %627 = vmatpush1.bf16.msra.mxu0 %v1044_v50  ;;  %v1075_v50 = vld [vmem:[#allocation13 + $0x48] sm:$0xff]  }
 0x1ab   :  { %645 = vmatmul.mubr.bf16.vlgmr.msra.gmra.mxu0 %v503_v52 }
 0x24b   :  { %v307_v10 = vpop.f32.mrf.mxu0 }
 0x24c   :  { %v308_v11 = vadd.f32 %v307_v10, %v186_v8 }
 0x24d   :  { %v309_v12 = vpop.f32.mrf.mxu0 }
 0x24e   :  { %v316_v13 = vmul.f32 0.70710677, %v308_v11  ;;  %v310_v14 = vadd.f32 %v309_v12, %v190_v9  ;;  %v314_v21 = vmul.f32 0.5, %v308_v11 }
 0x24f   :  { %v311_v15 = vpop.f32.mrf.mxu0 }
 0x250   :  { %1081 = verf.f32 %v316_v13  ;;  %v317_v16 = vmul.f32 0.70710677, %v310_v14  ;;  %v315_v22 = vmul.f32 0.5, %v310_v14 }
 0x251   :  { %v312_v17 = vpop.f32.mrf.mxu0 }
 0x252   :  { %1083 = verf.f32 %v317_v16 }
 0x25d   :  { %v1082_v18 = vpop.eup %1081 }
 0x25e   :  { %v320_v19 = vadd.f32 1.0, %v1082_v18 }
 0x25f   :  { %v1084_v20 = vpop.eup %1083 }
 0x260   :  { %v321_v23 = vadd.f32 1.0, %v1084_v20  ;;  %v322_v24 = vmul.f32 %v320_v19, %v314_v21 }
 0x262   :  { %v323_v25 = vmul.f32 %v321_v23, %v315_v22  ;;  %v324_v28 = vpack.c.bf16 %v322_v24, %v322_v24 }
 0x264   :  { %v325_v26 = vpack.c.bf16 %v323_v25, %v323_v25 }
 0x266   :  { %493 = vmatprep.mubr.bf16.mxu1 %v325_v26 }
 0x267   :  { %494 = vmatmul.mubr.bf16.vlgmr.msra.gmra.mxu1 %v324_v28 }
 0x268   :  { %964 = vmatpush3.bf16.msra.mxu1 %v1064_v27 }
 0x269   :  { %965 = vmatprep.subr.bf16.mxu1 %v1065_v30 }
 0x26b   :  { %v646_v35 = vpop.f32.mrf.mxu0 }
 0x26c   :  { %v647_v36 = vadd.f32 %v646_v35, %v525_v31  ;;  %966 = vmatpush3.bf16.msra.mxu1 %v1066_v32 }
 0x26d   :  { %v648_v38 = vpop.f32.mrf.mxu0  ;;  %967 = vmatprep.subr.bf16.mxu1 %v1067_v33 }
 0x26e   :  { %v655_v40 = vmul.f32 0.70710677, %v647_v36  ;;  %v649_v41 = vadd.f32 %v648_v38, %v529_v34  ;;  %v653_v56 = vmul.f32 0.5, %v647_v36 }
 0x26f   :  { %v650_v42 = vpop.f32.mrf.mxu0 }
 0x270   :  { %1085 = verf.f32 %v655_v40  ;;  %v656_v43 = vmul.f32 0.70710677, %v649_v41  ;;  %968 = vmatpush3.bf16.msra.mxu1 %v1068_v37  ;;  %v654_v57 = vmul.f32 0.5, %v649_v41 }
 0x271   :  { %v651_v45 = vpop.f32.mrf.mxu0  ;;  %969 = vmatprep.subr.bf16.mxu1 %v1069_v39 }
 0x272   :  { %1087 = verf.f32 %v656_v43 }
 0x274   :  { %970 = vmatpush3.bf16.msra.mxu1 %v1070_v44 }
 0x275   :  { %971 = vmatprep.subr.bf16.mxu1 %v1071_v46 }
 0x278   :  { %972 = vmatpush3.bf16.msra.mxu1 %v1072_v47 }
 0x279   :  { %973 = vmatprep.subr.bf16.mxu1 %v1073_v48 }
 0x27c   :  { %974 = vmatpush3.bf16.msra.mxu1 %v1074_v49 }
 0x27d   :  { %v1086_v52 = vpop.eup %1085  ;;  %975 = vmatprep.subr.bf16.mxu1 %v1075_v50 }
 0x27e   :  { %v659_v54 = vadd.f32 1.0, %v1086_v52 }
 0x27f   :  { %v1088_v55 = vpop.eup %1087 }
 0x280   :  { %976 = vmatpush3.bf16.msra.mxu1 %v1076_v51  ;;  %v660_v59 = vadd.f32 1.0, %v1088_v55  ;;  %v661_v60 = vmul.f32 %v659_v54, %v653_v56 }
 0x281   :  { %977 = vmatprep.subr.bf16.mxu1 %v1077_v53 }
 0x282   :  { %v662_v61 = vmul.f32 %v660_v59, %v654_v57  ;;  %v663_v63 = vpack.c.bf16 %v661_v60, %v661_v60 }
 0x284   :  { %978 = vmatpush3.bf16.msra.mxu1 %v1078_v58  ;;  %v664_v62 = vpack.c.bf16 %v662_v61, %v662_v61 }
 0x286   :  { %832 = vmatprep.mubr.bf16.mxu1 %v664_v62 }
 0x287   :  { %833 = vmatmul.mubr.bf16.vlgmr.msra.gmra.mxu1 %v663_v63 }
 0x327   :  { %v957_v0 = vpop.f32.mrf.mxu1 }
 0x329   :  { %v958_v2 = vpop.f32.mrf.mxu1 }
 0x32a   :  { %v959_v3 = vadd.f32 %v958_v2, %v957_v0 }
 0x32b   :  { %v960_v4 = vpop.f32.mrf.mxu1 }
 0x32c   :  { %v496_v5 = vadd.f32 %v959_v3, %v891_v1 }
 0x32d   :  { %v961_v6 = vpop.f32.mrf.mxu1 }
 0x32e   :  { %501 = vst [vmem:[#allocation14] sm:$0xff] %v496_v5 }
 0x32f   :  { %1240 = shalt.err (!%p1237_p11)
}
 0x330   :  { %850 = dma.vmem_to_hbm [thread:$0]  %s848_s28, 128, %s1419_s12, [#allocation4]   ;;  %v924_v8 = vld [vmem:[%s1418_s11] ss:$0 sm:$0xff] }
 0x331   :  { %s1294_s8 = smov [#allocation15]  }
 0x332   :  { %s857_s16 = sshll.u32 %s1294_s8, 4  ;;  %s858_s16 = int_to_ptr.vmem [resolvable:$true] %s857_s16 }
 0x333   :  { %s1249_s17 = scalar_lea.vmem %s858_s16, 128  ;;  %p1254_p13 = scmp.lt.s32.totalorder %s858_s16, %s858_s16 }
 0x334   :  { %p1250_p12 = scmp.ne.s32.totalorder %s858_s16, %s1249_s17  ;;  %p1255_p0 = scmp.lt.s32.totalorder %s1249_s17, %s1249_s17 }
 0x336   :  { %p1256_p1 = por %p1255_p0, %p1254_p13 }
 0x338   :  { %p1257_p2 = pnand %p1256_p1, %p1250_p12 }
 0x347   :  { %v979_v7 = vpop.f32.mrf.mxu1 }
 0x349   :  { %v980_v9 = vpop.f32.mrf.mxu1 }
 0x34a   :  { %v981_v10 = vadd.f32 %v980_v9, %v979_v7 }
 0x34b   :  { %v982_v11 = vpop.f32.mrf.mxu1 }
 0x34c   :  { %v835_v12 = vadd.f32 %v981_v10, %v924_v8 }
 0x34d   :  { %v983_v13 = vpop.f32.mrf.mxu1 }
 0x34e   :  { %840 = vst [vmem:[#allocation15] sm:$0xff] %v835_v12 }
 0x34f   :  { %1260 = shalt.err (!%p1257_p2)
}
 0x350   :  { %860 = dma.vmem_to_hbm [thread:$0]  %s858_s16, 128, %s1420_s13, [#allocation16]  }
 0x351   :  { %1277 = dma.done.wait [#allocation4], 128  }
 0x352   :  { %1278 = vsyncadd [#allocation4], 4294967168 }
 0x353   :  { %1279 = dma.done.wait [#allocation16], 128  }
 0x354   :  { %1280 = vsyncadd [#allocation16], 4294967168 }
 0x355   :  { %867 = vsyncpa [#allocation3], 1 }
 0x356   :  { %868 = vsyncpa [#allocation6], 1 }
 0x357   :  { %869 = vsyncpa [#allocation9], 1 }
 0x358   :  { %870 = vsyncpa [#allocation12], 1 }
 0x359   :  { %871 = vsyncpa [#allocation4], 1 }
 0x35a   :  { %872 = vsyncpa [#allocation16], 1 }

</bundles_post_ra>
